<compile_context>
chip_gen: v5e
topology: v5e:2x2
jax: 0.10.0
libtpu: 0.0.40
codegen_flags: <defaults>
</compile_context>

<pallas_src>
import functools

import jax
import jax.numpy as jnp
from jax.experimental import pallas as pl
from jax.experimental.pallas import tpu as pltpu


def _round_up(x, m):
    return ((x + m - 1) // m) * m


@functools.lru_cache(maxsize=1)
def _chip_info():
    """Returns (physical_vmem_bytes, mxu_width, num_tensorcores), conservative fallbacks."""
    kind = ""
    try:
        kind = jax.devices()[0].device_kind.lower()
    except Exception:
        pass
    if "v7" in kind:
        vmem, mxu, ntc = 64 << 20, 256, 2
    elif "v6" in kind:
        vmem, mxu, ntc = 128 << 20, 256, 1
    elif "v5" in kind:
        vmem, mxu, ntc = 128 << 20, 128, 1
    else:                                    # unknown chip: stay conservative
        vmem, mxu, ntc = 64 << 20, 128, 1
    try:
        vmem = int(pltpu.get_tpu_info().vmem_capacity_bytes)
    except Exception:
        pass
    return vmem, mxu, ntc


# ---------------------------------------------------------------------------
# Fused whole-MLP kernel: all layers chained in one body, weights VMEM-resident.
# ---------------------------------------------------------------------------
def _fused_mlp_kernel(*refs, n_layers, relu_on_last, squash, softmax, out_true):
    x_ref = refs[0]
    o_ref = refs[-1]
    wb = refs[1:-1]                       # w0, b0, w1, b1, ...

    h = x_ref[...]                        # (TM, IN) bf16
    for i in range(n_layers):
        # TODO(synk): if bundle dump shows vld/vst slot saturation on very wide
        # layers, chunk this dot over K with lax.fori_loop over pl.ds weight
        # slices (f32 accumulator) to bound live ranges.
        w = wb[2 * i][...]                # (IN_i, OUT_i) bf16, resident in VMEM
        b = wb[2 * i + 1][...]            # (1, OUT_i)   f32
        y = jnp.dot(h, w, preferred_element_type=jnp.float32) + b
        last = (i == n_layers - 1)
        if (not last) or relu_on_last:
            y = jnp.maximum(y, 0.0)       # ReLU in f32 on the VPU
        if not last:
            h = y.astype(jnp.bfloat16)    # bf16 feed to the next MXU pass
        else:
            if squash:
                y = jnp.tanh(y)           # EUP
            if softmax:
                if out_true < y.shape[-1]:
                    # Mask padded lanes so they don't contribute to the denominator.
                    col = jax.lax.broadcasted_iota(jnp.int32, y.shape, 1)
                    y = jnp.where(col < out_true, y, -1e30)
                m = jnp.max(y, axis=-1, keepdims=True)
                e = jnp.exp(y - m)
                y = e / jnp.sum(e, axis=-1, keepdims=True)   # exact normalization
            o_ref[...] = y.astype(o_ref.dtype)


# ---------------------------------------------------------------------------
# Per-layer tiled Linear(+activation) kernel — fallback for very large layers.
# ---------------------------------------------------------------------------
def _linear_tiled_kernel(x_ref, w_ref, b_ref, o_ref, acc_ref, *, activation):
    k = pl.program_id(2)

    @pl.when(k == 0)
    def _():
        acc_ref[...] = jnp.zeros_like(acc_ref)

    acc_ref[...] += jnp.dot(x_ref[...], w_ref[...],
                            preferred_element_type=jnp.float32)

    @pl.when(k == pl.num_programs(2) - 1)
    def _():
        y = acc_ref[...] + b_ref[...]
        if activation == "relu":
            y = jnp.maximum(y, 0.0)
        elif activation == "tanh":
            y = jnp.tanh(y)
        o_ref[...] = y.astype(o_ref.dtype)


def _linear_tiled(hp, wt, bp, activation, out_dtype):
    """y = act(hp @ wt + bp) with M/N/K tiling. hp: (Bp, IN_p) bf16, wt: (IN_p, OUT_p) bf16."""
    vmem_cap, mxu_width, _ = _chip_info()
    Bp, in_p = hp.shape
    _, out_p = wt.shape

    # M tile: as big as possible (Bp is a multiple of 16 from the wrapper).
    if Bp <= (256 if mxu_width >= 256 else 128):
        tm = Bp
    elif mxu_width >= 256 and Bp % 256 == 0:
        tm = 256
    else:
        tm = 128
    # N tile matches MXU width (256 on v6e/v7x, 128 on v5e); K tile as large as divisible.
    tn = 256 if (mxu_width >= 256 and out_p % 256 == 0) else 128
    tk = 512 if in_p % 512 == 0 else (256 if in_p % 256 == 0 else 128)
    grid = (Bp // tm, out_p // tn, in_p // tk)

    vmem_bytes = (2 * (tm * tk * 2 + tk * tn * 2 + tn * 4)        # double-buffered inputs
                  + tm * tn * 4                                    # f32 accumulator
                  + 2 * tm * tn * jnp.dtype(out_dtype).itemsize    # output buffers
                  + (2 << 20))                                     # headroom
    vmem_limit = int(min(max(vmem_bytes, 16 << 20), vmem_cap - (8 << 20)))

    kernel = functools.partial(_linear_tiled_kernel, activation=activation)
    return pl.pallas_call(
        kernel,
        out_shape=jax.ShapeDtypeStruct((Bp, out_p), out_dtype),
        grid_spec=pltpu.PrefetchScalarGridSpec(
            num_scalar_prefetch=0,
            grid=grid,
            in_specs=[
                pl.BlockSpec((tm, tk), lambda i, j, k: (i, k)),
                pl.BlockSpec((tk, tn), lambda i, j, k: (k, j)),
                pl.BlockSpec((1, tn), lambda i, j, k: (0, j)),
            ],
            out_specs=pl.BlockSpec((tm, tn), lambda i, j, k: (i, j)),
            scratch_shapes=[pltpu.VMEM((tm, tn), jnp.float32)],
        ),
        compiler_params=pltpu.CompilerParams(
            dimension_semantics=("parallel", "parallel", "arbitrary"),
            vmem_limit_bytes=vmem_limit,
        ),
    )(hp, wt, bp)


# ---------------------------------------------------------------------------
# Parameter init (mirrors nn.Linear shapes) and one-time preparation.
# ---------------------------------------------------------------------------
def init_mlp_params(key, input_dim, output_dim, net_arch):
    dims = [input_dim] + list(net_arch)
    params = []
    for i in range(len(dims) - 1):
        key, k1, k2 = jax.random.split(key, 3)
        bound = 1.0 / jnp.sqrt(dims[i])
        w = jax.random.uniform(k1, (dims[i + 1], dims[i]), jnp.float32, -bound, bound)
        b = jax.random.uniform(k2, (dims[i + 1],), jnp.float32, -bound, bound)
        params.append((w, b))
    if output_dim > 0:
        key, k1, k2 = jax.random.split(key, 3)
        bound = 1.0 / jnp.sqrt(dims[-1])
        w = jax.random.uniform(k1, (output_dim, dims[-1]), jnp.float32, -bound, bound)
        b = jax.random.uniform(k2, (output_dim,), jnp.float32, -bound, bound)
        params.append((w, b))
    return params


def prepare_params(params):
    """One-time prep: transpose to (IN, OUT), pad in/out to multiples of 128, cast W to bf16."""
    prepped = []
    for (w, b) in params:
        out_d, in_d = w.shape
        in_p, out_p = _round_up(in_d, 128), _round_up(out_d, 128)
        wt = jnp.zeros((in_p, out_p), jnp.bfloat16)
        wt = wt.at[:in_d, :out_d].set(w.T.astype(jnp.bfloat16))
        bp = jnp.zeros((1, out_p), jnp.float32)
        bp = bp.at[0, :out_d].set(b)
        prepped.append((wt, bp, in_d, out_d))
    return prepped


# ---------------------------------------------------------------------------
# Forward pass.
# ---------------------------------------------------------------------------
def mlp_forward(x, prepped, output_dim, squash_output=False, softmax_output=False,
                force_tiled=False):
    vmem_cap, mxu_width, num_tc = _chip_info()

    B = x.shape[0]
    h = x.reshape(B, -1).astype(jnp.bfloat16)       # nn.Flatten + single cast to bf16
    in_true = h.shape[1]
    in_p = prepped[0][0].shape[0]
    assert in_true == prepped[0][2], "flattened input dim must match first Linear"

    # Batch tile: multiple of 16 (bf16 packs (16,128) per vreg); up to 256 rows
    # on 256-wide-MXU chips. On v7x split a single-tile grid so both TCs work.
    B16 = _round_up(B, 16)
    tm_cap = 256 if mxu_width >= 256 else 128
    TM = B16 if B16 <= tm_cap else tm_cap
    Bp = _round_up(B, TM)
    if num_tc >= 2 and Bp // TM == 1 and TM >= 32:
        TM //= 2                                     # grid=(2,) -> one tile per TensorCore

    # Pad only when needed (common case: plain reshape + cast, no extra HBM copy).
    if B == Bp and in_true == in_p:
        hp = h
    else:
        hp = jnp.pad(h, ((0, Bp - B), (0, in_p - in_true)))

    # Resident-weight footprint (single-buffered) decides fused vs. tiled path.
    resident = sum(int(w.size) * 2 + int(b.size) * 4 for (w, b, _, _) in prepped)
    fuse_budget = int(vmem_cap * 0.70)               # ~90 MiB on v5e/v6e, ~45 MiB on v7x
    fuse = (not force_tiled) and (resident <= fuse_budget)

    if fuse:
        out_p = prepped[-1][0].shape[1]
        out_true = prepped[-1][3]
        relu_on_last = (output_dim == 0)
        kernel = functools.partial(
            _fused_mlp_kernel, n_layers=len(prepped), relu_on_last=relu_on_last,
            squash=squash_output, softmax=softmax_output, out_true=out_true)

        in_specs = [pl.BlockSpec((TM, in_p), lambda i: (i, 0))]
        args = [hp]
        vmem = resident                              # single-buffered weights/biases
        vmem += 2 * TM * in_p * 2                    # double-buffered input block (bf16)
        vmem += 2 * TM * out_p * 4                   # double-buffered output block (f32)
        for (w, b, _, _) in prepped:
            in_specs.append(pl.BlockSpec(w.shape, lambda i: (0, 0),
                                         pipeline_mode=pl.Buffered(1)))
            in_specs.append(pl.BlockSpec(b.shape, lambda i: (0, 0),
                                         pipeline_mode=pl.Buffered(1)))
            args += [w, b]
            vmem += 8 * TM * int(w.shape[1])         # inter-layer activations (f32 + bf16)
        vmem += (2 << 20)                            # compiler internal scratch headroom
        vmem_limit = int(min(max(vmem, 16 << 20), vmem_cap - (8 << 20)))

        out = pl.pallas_call(
            kernel,
            out_shape=jax.ShapeDtypeStruct((Bp, out_p), jnp.float32),
            grid_spec=pltpu.PrefetchScalarGridSpec(
                num_scalar_prefetch=0,
                grid=(Bp // TM,),
                in_specs=in_specs,
                out_specs=pl.BlockSpec((TM, out_p), lambda i: (i, 0)),
            ),
            compiler_params=pltpu.CompilerParams(
                dimension_semantics=("parallel",),
                vmem_limit_bytes=vmem_limit,
            ),
        )(*args)
        return out[:B, :out_true]

    # -------- per-layer tiled fallback (only for very large layers) --------
    # TODO(synk): for oversized MLPs, keep activations VMEM-resident and stream
    # only the oversized layer's weight over K (memory_space=pl.ANY + emit_pipeline)
    # instead of round-tripping activations through HBM between layers.
    n = len(prepped)
    for i, (w, b, _, _) in enumerate(prepped):
        is_final_linear = (output_dim > 0) and (i == n - 1)
        if not is_final_linear:
            hp = _linear_tiled(hp, w, b, "relu", jnp.bfloat16)
        else:
            act = "tanh" if squash_output else "none"
            hp = _linear_tiled(hp, w, b, act, jnp.float32)
    out_true = prepped[-1][3]
    out = hp[:B, :out_true].astype(jnp.float32)
    if output_dim == 0 and squash_output:
        out = jnp.tanh(out)
    if softmax_output:
        out = jax.nn.softmax(out, axis=1)
    return out


# ---------------------------------------------------------------------------
# Plain-JAX reference with the same bf16-input / f32-accumulate numerics.
# ---------------------------------------------------------------------------
def reference_forward(x, params, output_dim, squash_output, softmax_output):
    B = x.shape[0]
    h = x.reshape(B, -1).astype(jnp.float32)
    n_hidden = len(params) - 1 if output_dim > 0 else len(params)
    for i in range(n_hidden):
        w, b = params[i]
        y = jnp.dot(h.astype(jnp.bfloat16), w.T.astype(jnp.bfloat16),
                    preferred_element_type=jnp.float32) + b
        h = jnp.maximum(y, 0.0)
    if output_dim > 0:
        w, b = params[-1]
        h = jnp.dot(h.astype(jnp.bfloat16), w.T.astype(jnp.bfloat16),
                    preferred_element_type=jnp.float32) + b
    if squash_output:
        h = jnp.tanh(h)
    if softmax_output:
        h = jax.nn.softmax(h, axis=1)
    return h


if __name__ == "__main__":
    key = jax.random.PRNGKey(0)
    k_x, k_p = jax.random.split(key)

    # NCHW input, flattened like nn.Flatten: (2, 4, 16, 16) -> (2, 1024)
    x = jax.random.normal(k_x, (2, 4, 16, 16), dtype=jnp.float32)
    input_dim, net_arch, output_dim = 4 * 16 * 16, [64, 32], 8

    params = init_mlp_params(k_p, input_dim, output_dim, net_arch)
    prepped = prepare_params(params)          # one-time transpose/pad/bf16-cast

    # 1) fused path, plain output
    out = jax.block_until_ready(mlp_forward(x, prepped, output_dim))
    ref = reference_forward(x, params, output_dim, False, False)
    assert out.shape == (2, output_dim)
    assert jnp.allclose(out, ref, atol=5e-3, rtol=5e-3), "fused path mismatch"

    # 2) fused path, tanh -> softmax epilogue fused in-kernel
    out2 = jax.block_until_ready(
        mlp_forward(x, prepped, output_dim, squash_output=True, softmax_output=True))
    ref2 = reference_forward(x, params, output_dim, True, True)
    assert jnp.allclose(out2, ref2, atol=5e-3, rtol=5e-3), "tanh+softmax epilogue mismatch"

    # 3) tiled fallback path (forced), exercises M/N/K tiling + accumulator
    params_big = init_mlp_params(k_p, 1024, 128, [256])
    prepped_big = prepare_params(params_big)
    x_big = jax.random.normal(k_x, (16, 1024), dtype=jnp.float32)
    out3 = jax.block_until_ready(
        mlp_forward(x_big, prepped_big, 128, force_tiled=True))
    ref3 = reference_forward(x_big, params_big, 128, False, False)
    assert out3.shape == (16, 128)
    assert jnp.allclose(out3, ref3, atol=5e-3, rtol=5e-3), "tiled path mismatch"

    print("KERNEL_OK")
</pallas_src>

<mosaic_0001>
module attributes {stable_mosaic.version = 11 : i64} {
  func.func @_fused_mlp_kernel(%arg0: i32, %arg1: memref<16x1024xbf16, #tpu.memory_space<vmem>>, %arg2: memref<1024x128xbf16, #tpu.memory_space<vmem>>, %arg3: memref<1x128xf32, #tpu.memory_space<vmem>>, %arg4: memref<128x128xbf16, #tpu.memory_space<vmem>>, %arg5: memref<1x128xf32, #tpu.memory_space<vmem>>, %arg6: memref<128x128xbf16, #tpu.memory_space<vmem>>, %arg7: memref<1x128xf32, #tpu.memory_space<vmem>>, %arg8: memref<16x128xf32, #tpu.memory_space<vmem>>) attributes {dimension_semantics = [#tpu.dimension_semantics<parallel>], iteration_bounds = array<i64: 1>, scalar_prefetch = 0 : i64, scratch_operands = 0 : i64, tpu.core_type = #tpu.core_type<tc>, window_params = [{transform_indices = @transform_0, window_bounds = array<i64: 16, 1024>}, {pipeline_mode = #tpu.pipeline_mode<synchronous>, transform_indices = @transform_1, window_bounds = array<i64: 1024, 128>}, {pipeline_mode = #tpu.pipeline_mode<synchronous>, transform_indices = @transform_2, window_bounds = array<i64: 1, 128>}, {pipeline_mode = #tpu.pipeline_mode<synchronous>, transform_indices = @transform_3, window_bounds = array<i64: 128, 128>}, {pipeline_mode = #tpu.pipeline_mode<synchronous>, transform_indices = @transform_4, window_bounds = array<i64: 1, 128>}, {pipeline_mode = #tpu.pipeline_mode<synchronous>, transform_indices = @transform_5, window_bounds = array<i64: 128, 128>}, {pipeline_mode = #tpu.pipeline_mode<synchronous>, transform_indices = @transform_6, window_bounds = array<i64: 1, 128>}, {transform_indices = @transform_7, window_bounds = array<i64: 16, 128>}]} {
    %c0 = arith.constant 0 : index
    %c0_0 = arith.constant 0 : index
    %0 = vector.load %arg1[%c0, %c0_0] : memref<16x1024xbf16, #tpu.memory_space<vmem>>, vector<16x1024xbf16>
    %c0_1 = arith.constant 0 : index
    %c0_2 = arith.constant 0 : index
    %1 = vector.load %arg2[%c0_1, %c0_2] : memref<1024x128xbf16, #tpu.memory_space<vmem>>, vector<1024x128xbf16>
    %c0_3 = arith.constant 0 : index
    %c0_4 = arith.constant 0 : index
    %2 = vector.load %arg3[%c0_3, %c0_4] : memref<1x128xf32, #tpu.memory_space<vmem>>, vector<1x128xf32>
    %cst = arith.constant dense<0.000000e+00> : vector<16x128xf32>
    %3 = tpu.matmul %0, %1, %cst {dimension_numbers = #tpu.dot_dimension_numbers<[1], [0], [0], [1], [0, 0, 1, 1], [], []>} : vector<16x1024xbf16>, vector<1024x128xbf16>, vector<16x128xf32> -> vector<16x128xf32>
    %4 = vector.broadcast %2 : vector<1x128xf32> to vector<16x128xf32>
    %5 = arith.addf %3, %4 : vector<16x128xf32>
    %cst_5 = arith.constant 0.000000e+00 : f32
    %6 = vector.broadcast %cst_5 : f32 to vector<16x128xf32>
    %7 = arith.maximumf %5, %6 : vector<16x128xf32>
    %8 = arith.truncf %7 : vector<16x128xf32> to vector<16x128xbf16>
    %c0_6 = arith.constant 0 : index
    %c0_7 = arith.constant 0 : index
    %9 = vector.load %arg4[%c0_6, %c0_7] : memref<128x128xbf16, #tpu.memory_space<vmem>>, vector<128x128xbf16>
    %c0_8 = arith.constant 0 : index
    %c0_9 = arith.constant 0 : index
    %10 = vector.load %arg5[%c0_8, %c0_9] : memref<1x128xf32, #tpu.memory_space<vmem>>, vector<1x128xf32>
    %cst_10 = arith.constant dense<0.000000e+00> : vector<16x128xf32>
    %11 = tpu.matmul %8, %9, %cst_10 {dimension_numbers = #tpu.dot_dimension_numbers<[1], [0], [0], [1], [0, 0, 1, 1], [], []>} : vector<16x128xbf16>, vector<128x128xbf16>, vector<16x128xf32> -> vector<16x128xf32>
    %12 = vector.broadcast %10 : vector<1x128xf32> to vector<16x128xf32>
    %13 = arith.addf %11, %12 : vector<16x128xf32>
    %cst_11 = arith.constant 0.000000e+00 : f32
    %14 = vector.broadcast %cst_11 : f32 to vector<16x128xf32>
    %15 = arith.maximumf %13, %14 : vector<16x128xf32>
    %16 = arith.truncf %15 : vector<16x128xf32> to vector<16x128xbf16>
    %c0_12 = arith.constant 0 : index
    %c0_13 = arith.constant 0 : index
    %17 = vector.load %arg6[%c0_12, %c0_13] : memref<128x128xbf16, #tpu.memory_space<vmem>>, vector<128x128xbf16>
    %c0_14 = arith.constant 0 : index
    %c0_15 = arith.constant 0 : index
    %18 = vector.load %arg7[%c0_14, %c0_15] : memref<1x128xf32, #tpu.memory_space<vmem>>, vector<1x128xf32>
    %cst_16 = arith.constant dense<0.000000e+00> : vector<16x128xf32>
    %19 = tpu.matmul %16, %17, %cst_16 {dimension_numbers = #tpu.dot_dimension_numbers<[1], [0], [0], [1], [0, 0, 1, 1], [], []>} : vector<16x128xbf16>, vector<128x128xbf16>, vector<16x128xf32> -> vector<16x128xf32>
    %20 = vector.broadcast %18 : vector<1x128xf32> to vector<16x128xf32>
    %21 = arith.addf %19, %20 : vector<16x128xf32>
    %c0_17 = arith.constant 0 : index
    %c0_18 = arith.constant 0 : index
    %22 = vector.load %arg8[%c0_17, %c0_18] : memref<16x128xf32, #tpu.memory_space<vmem>>, vector<16x128xf32>
    tpu.vector_store %arg8[%c0_17, %c0_18], %21 {strides = array<i32>} : memref<16x128xf32, #tpu.memory_space<vmem>>, vector<16x128xf32>,
    return
  }
  func.func @transform_0(%arg0: i32) -> (i32, i32) {
    %c0_i32 = arith.constant 0 : i32
    %c0_i32_0 = arith.constant 0 : i32
    return %arg0, %c0_i32 : i32, i32
  }
  func.func @transform_1(%arg0: i32) -> (i32, i32) {
    %c0_i32 = arith.constant 0 : i32
    %c0_i32_0 = arith.constant 0 : i32
    %c0_i32_1 = arith.constant 0 : i32
    return %c0_i32, %c0_i32_0 : i32, i32
  }
  func.func @transform_2(%arg0: i32) -> (i32, i32) {
    %c0_i32 = arith.constant 0 : i32
    %c0_i32_0 = arith.constant 0 : i32
    %c0_i32_1 = arith.constant 0 : i32
    return %c0_i32, %c0_i32_0 : i32, i32
  }
  func.func @transform_3(%arg0: i32) -> (i32, i32) {
    %c0_i32 = arith.constant 0 : i32
    %c0_i32_0 = arith.constant 0 : i32
    %c0_i32_1 = arith.constant 0 : i32
    return %c0_i32, %c0_i32_0 : i32, i32
  }
  func.func @transform_4(%arg0: i32) -> (i32, i32) {
    %c0_i32 = arith.constant 0 : i32
    %c0_i32_0 = arith.constant 0 : i32
    %c0_i32_1 = arith.constant 0 : i32
    return %c0_i32, %c0_i32_0 : i32, i32
  }
  func.func @transform_5(%arg0: i32) -> (i32, i32) {
    %c0_i32 = arith.constant 0 : i32
    %c0_i32_0 = arith.constant 0 : i32
    %c0_i32_1 = arith.constant 0 : i32
    return %c0_i32, %c0_i32_0 : i32, i32
  }
  func.func @transform_6(%arg0: i32) -> (i32, i32) {
    %c0_i32 = arith.constant 0 : i32
    %c0_i32_0 = arith.constant 0 : i32
    %c0_i32_1 = arith.constant 0 : i32
    return %c0_i32, %c0_i32_0 : i32, i32
  }
  func.func @transform_7(%arg0: i32) -> (i32, i32) {
    %c0_i32 = arith.constant 0 : i32
    %c0_i32_0 = arith.constant 0 : i32
    return %arg0, %c0_i32 : i32, i32
  }
}

</mosaic_0001>

<bundles_post_ra>
// kernel: tpu_custom_call.1
= control target key start
LH: loop header
LB: loop body
LE: loop exit
PB: predicated region body
PF: predicated region fallthrough
CT: control target
= control target key end

     0   :  { %12 = vsyncpa [#allocation3], 0  ;;  %s1616_s0 = inlined_call_operand.hbm [shape: bf16[16,1024], index: 0, kind: input, shape index: {}]   ;;  %s1617_s1 = inlined_call_operand.hbm [shape: bf16[1024,128], index: 1, kind: input, shape index: {}]   ;;  %s1618_s2 = inlined_call_operand.vmem [shape: f32[1,128], index: 2, kind: input, shape index: {}]   ;;  %s1619_s3 = inlined_call_operand.hbm [shape: bf16[128,128], index: 3, kind: input, shape index: {}]   ;;  %s1620_s4 = inlined_call_operand.vmem [shape: f32[1,128], index: 4, kind: input, shape index: {}]   ;;  %s1621_s5 = inlined_call_operand.hbm [shape: bf16[128,128], index: 5, kind: input, shape index: {}]   ;;  %s1622_s6 = inlined_call_operand.vmem [shape: f32[1,128], index: 6, kind: input, shape index: {}]   ;;  %s1623_s7 = inlined_call_operand.hbm [shape: f32[16,128], index: 7, kind: output, shape index: {}]  }
   0x1   :  { %13 = vsyncpa [#allocation6], 0 }
   0x2   :  { %14 = vsyncpa [#allocation9], 0  ;;  %s33_s26 = sshll.u32 %s1617_s1, 4  ;;  %s34_s26 = int_to_ptr.hbm [resolvable:$true] %s33_s26 }
   0x3   :  { %15 = vsyncpa [#allocation4], 0  ;;  %s1541_s27 = smov [#allocation5]   ;;  %s20_s8 = sshll.u32 %s1616_s0, 4  ;;  %s21_s8 = int_to_ptr.hbm [resolvable:$true] %s20_s8 }
   0x4   :  { %s35_s28 = sshll.u32 %s1541_s27, 4  ;;  %s1542_s9 = smov 64   ;;  %s36_s28 = int_to_ptr.vmem [resolvable:$true] %s35_s28 }
   0x5   :  { %s1543_s10 = smov 4   ;;  %s1544_s11 = smov [#allocation2]  }
   0x6   :  { %41 = dma.hbm_to_vmem [thread:$0]  %s34_s26, 8192, %s36_s28, [#allocation6], %s1542_s9, %s1542_s9, %s1543_s10  }
   0x7   :  { %s22_s12 = sshll.u32 %s1544_s11, 4  ;;  %s1545_s13 = smov 512   ;;  %s23_s12 = int_to_ptr.vmem [resolvable:$true] %s22_s12 }
   0x8   :  { %s1546_s14 = smov 32   ;;  %s48_s16 = sshll.u32 %s1619_s3, 4  ;;  %s49_s16 = int_to_ptr.hbm [resolvable:$true] %s48_s16 }
   0x9   :  { %28 = dma.hbm_to_vmem [thread:$0]  %s21_s8, 1024, %s23_s12, [#allocation3], %s1545_s13, %s1545_s13, %s1546_s14  }
   0xa   :  { %s1547_s17 = smov [#allocation7]   ;;  %s63_s20 = sshll.u32 %s1621_s5, 4  ;;  %s64_s20 = int_to_ptr.hbm [resolvable:$true] %s63_s20 }
   0xb   :  { %s50_s18 = sshll.u32 %s1547_s17, 4  ;;  %s1548_s21 = smov [#allocation8]   ;;  %s51_s18 = int_to_ptr.vmem [resolvable:$true] %s50_s18 }
   0xc   :  { %56 = dma.hbm_to_vmem [thread:$0]  %s49_s16, 1024, %s51_s18, [#allocation6], %s1542_s9, %s1542_s9, %s1543_s10  }
   0xd   :  { %s65_s22 = sshll.u32 %s1548_s21, 4  ;;  %s66_s22 = int_to_ptr.vmem [resolvable:$true] %s65_s22 }
   0xe   :  { %71 = dma.hbm_to_vmem [thread:$0]  %s64_s20, 1024, %s66_s22, [#allocation9], %s1542_s9, %s1542_s9, %s1543_s10  }
   0xf   :  { %1533 = dma.done.wait [#allocation3], 1024  }
  0x10   :  { %1534 = vsyncadd [#allocation3], 4294966272 }
  0x11   :  { %1535 = dma.done.wait [#allocation6], 9216  }
  0x12   :  { %1536 = vsyncadd [#allocation6], 4294958080 }
  0x13   :  { %1537 = dma.done.wait [#allocation9], 1024  }
  0x14   :  { %1538 = vsyncadd [#allocation9], 4294966272  ;;  %v1326_v0 = vld [vmem:[#allocation5 + $0x38] sm:$0xff]  ;;  %v1325_v4 = vld [vmem:[#allocation5 + $0x30] sm:$0xff]  ;;  %s1549_s26 = smov [#allocation10]   ;;  %s1550_s30 = smov 128  }
  0x15   :  { %v1334_v1 = vld [vmem:[#allocation5 + $0x78] sm:$0xff]  ;;  %654 = vmatpush.bf16.msra.mxu0 %v1326_v0  ;;  %v1333_v5 = vld [vmem:[#allocation5 + $0x70] sm:$0xff]  ;;  %v1324_v8 = vld [vmem:[#allocation5 + $0x28] sm:$0xff]  ;;  %s942_s27 = sshll.u32 %s1549_s26, 4  ;;  %s1551_s8 = smov 8   ;;  %s943_s27 = int_to_ptr.vmem [resolvable:$true] %s942_s27 }
  0x16   :  { %v1342_v2 = vld [vmem:[#allocation5 + $0xb8] sm:$0xff]  ;;  %668 = vmatpush.bf16.msra.mxu1 %v1334_v1  ;;  %v1341_v6 = vld [vmem:[#allocation5 + $0xb0] sm:$0xff]  ;;  %v1332_v9 = vld [vmem:[#allocation5 + $0x68] sm:$0xff] }
  0x17   :  { %v1350_v3 = vld [vmem:[#allocation5 + $0xf8] sm:$0xff]  ;;  %682 = vmatpush.bf16.msra.mxu2 %v1342_v2  ;;  %v1349_v7 = vld [vmem:[#allocation5 + $0xf0] sm:$0xff]  ;;  %v1340_v10 = vld [vmem:[#allocation5 + $0xa8] sm:$0xff] }
  0x18   :  { %696 = vmatpush.bf16.msra.mxu3 %v1350_v3  ;;  %v1348_v11 = vld [vmem:[#allocation5 + $0xe8] sm:$0xff]  ;;  %v1323_v12 = vld [vmem:[#allocation5 + $0x20] sm:$0xff]  ;;  %v1322_v16 = vld [vmem:[#allocation5 + $0x18] sm:$0xff] }
  0x19   :  { %655 = vmatpush.bf16.msra.mxu0 %v1325_v4  ;;  %v1331_v13 = vld [vmem:[#allocation5 + $0x60] sm:$0xff]  ;;  %v1330_v17 = vld [vmem:[#allocation5 + $0x58] sm:$0xff]  ;;  %v1321_v20 = vld [vmem:[#allocation5 + $0x10] sm:$0xff] }
  0x1a   :  { %669 = vmatpush.bf16.msra.mxu1 %v1333_v5  ;;  %v1339_v14 = vld [vmem:[#allocation5 + $0xa0] sm:$0xff]  ;;  %v1338_v18 = vld [vmem:[#allocation5 + $0x98] sm:$0xff]  ;;  %v1329_v21 = vld [vmem:[#allocation5 + $0x50] sm:$0xff] }
  0x1b   :  { %683 = vmatpush.bf16.msra.mxu2 %v1341_v6  ;;  %v1347_v15 = vld [vmem:[#allocation5 + $0xe0] sm:$0xff]  ;;  %v1346_v19 = vld [vmem:[#allocation5 + $0xd8] sm:$0xff]  ;;  %v1337_v22 = vld [vmem:[#allocation5 + $0x90] sm:$0xff] }
  0x1c   :  { %697 = vmatpush.bf16.msra.mxu3 %v1349_v7  ;;  %v1345_v23 = vld [vmem:[#allocation5 + $0xd0] sm:$0xff]  ;;  %v1320_v24 = vld [vmem:[#allocation5 + $0x8] sm:$0xff]  ;;  %v1319_v28 = vld [vmem:[#allocation5] sm:$0xff] }
  0x1d   :  { %656 = vmatpush.bf16.msra.mxu0 %v1324_v8  ;;  %v1328_v25 = vld [vmem:[#allocation5 + $0x48] sm:$0xff]  ;;  %v1327_v29 = vld [vmem:[#allocation5 + $0x40] sm:$0xff]  ;;  %v1358_v32 = vld [vmem:[#allocation5 + $0x138] sm:$0xff] }
  0x1e   :  { %670 = vmatpush.bf16.msra.mxu1 %v1332_v9  ;;  %v1336_v26 = vld [vmem:[#allocation5 + $0x88] sm:$0xff]  ;;  %v1335_v30 = vld [vmem:[#allocation5 + $0x80] sm:$0xff]  ;;  %v1366_v33 = vld [vmem:[#allocation5 + $0x178] sm:$0xff] }
  0x1f   :  { %684 = vmatpush.bf16.msra.mxu2 %v1340_v10  ;;  %v1344_v27 = vld [vmem:[#allocation5 + $0xc8] sm:$0xff]  ;;  %v1343_v31 = vld [vmem:[#allocation5 + $0xc0] sm:$0xff]  ;;  %v1374_v42 = vld [vmem:[#allocation5 + $0x1b8] sm:$0xff] }
  0x20   :  { %698 = vmatpush.bf16.msra.mxu3 %v1348_v11  ;;  %v969_v34 = vld [vmem:[#allocation2 + $0x8] sm:$0xf]  ;;  %v961_v36 = vld [vmem:[#allocation2] sm:$0xf]  ;;  %v1312_v38 = vld [vmem:[#allocation2 + $0xc] sm:$0xf] }
  0x21   :  { %657 = vmatpush.bf16.msra.mxu0 %v1323_v12  ;;  %v1316_v35 = vld [vmem:[#allocation2 + $0x24] sm:$0xf0]  ;;  %v1315_v37 = vld [vmem:[#allocation2 + $0x1c] sm:$0xf0]  ;;  %v971_v39 = vld [vmem:[#allocation2 + $0x28] sm:$0xf0] }
  0x22   :  { %671 = vmatpush.bf16.msra.mxu1 %v1331_v13  ;;  %v1311_v40 = vld [vmem:[#allocation2 + $0x4] sm:$0xf]  ;;  %v1382_v43 = vld [vmem:[#allocation5 + $0x1f8] sm:$0xff]  ;;  %v970_v44 = vor.u32 %v1316_v35, %v969_v34  ;;  %v962_v45 = vor.u32 %v1315_v37, %v961_v36  ;;  %v974_v46 = vor.u32 %v1312_v38, %v971_v39  ;;  %v1357_v48 = vld [vmem:[#allocation5 + $0x130] sm:$0xff] }
  0x23   :  { %685 = vmatpush.bf16.msra.mxu2 %v1339_v14  ;;  %v963_v41 = vld [vmem:[#allocation2 + $0x20] sm:$0xf0]  ;;  %v1365_v49 = vld [vmem:[#allocation5 + $0x170] sm:$0xff]  ;;  %v1356_v52 = vld [vmem:[#allocation5 + $0x128] sm:$0xff] }
  0x24   :  { %699 = vmatpush.bf16.msra.mxu3 %v1347_v15  ;;  %v966_v47 = vor.u32 %v1311_v40, %v963_v41  ;;  %v1373_v50 = vld [vmem:[#allocation5 + $0x1b0] sm:$0xff]  ;;  %v1364_v53 = vld [vmem:[#allocation5 + $0x168] sm:$0xff]  ;;  %v1355_v56 = vld [vmem:[#allocation5 + $0x120] sm:$0xff] }
  0x25   :  { %658 = vmatpush.bf16.msra.mxu0 %v1322_v16  ;;  %v1381_v51 = vld [vmem:[#allocation5 + $0x1f0] sm:$0xff]  ;;  %v1372_v54 = vld [vmem:[#allocation5 + $0x1a8] sm:$0xff]  ;;  %v1363_v57 = vld [vmem:[#allocation5 + $0x160] sm:$0xff] }
  0x26   :  { %672 = vmatpush.bf16.msra.mxu1 %v1330_v17  ;;  %v1380_v55 = vld [vmem:[#allocation5 + $0x1e8] sm:$0xff]  ;;  %v1371_v58 = vld [vmem:[#allocation5 + $0x1a0] sm:$0xff]  ;;  %v1354_v60 = vld [vmem:[#allocation5 + $0x118] sm:$0xff] }
  0x27   :  { %686 = vmatpush.bf16.msra.mxu2 %v1338_v18  ;;  %v1379_v59 = vld [vmem:[#allocation5 + $0x1e0] sm:$0xff]  ;;  %v1362_v61 = vld [vmem:[#allocation5 + $0x158] sm:$0xff]  ;;  %v1353_v0 = vld [vmem:[#allocation5 + $0x110] sm:$0xff] }
  0x28   :  { %700 = vmatpush.bf16.msra.mxu3 %v1346_v19  ;;  %v1370_v62 = vld [vmem:[#allocation5 + $0x198] sm:$0xff]  ;;  %v1361_v1 = vld [vmem:[#allocation5 + $0x150] sm:$0xff]  ;;  %v1352_v4 = vld [vmem:[#allocation5 + $0x108] sm:$0xff] }
  0x29   :  { %659 = vmatpush.bf16.msra.mxu0 %v1321_v20  ;;  %v1378_v63 = vld [vmem:[#allocation5 + $0x1d8] sm:$0xff]  ;;  %v1369_v2 = vld [vmem:[#allocation5 + $0x190] sm:$0xff]  ;;  %v1360_v5 = vld [vmem:[#allocation5 + $0x148] sm:$0xff] }
  0x2a   :  { %673 = vmatpush.bf16.msra.mxu1 %v1329_v21  ;;  %v1377_v3 = vld [vmem:[#allocation5 + $0x1d0] sm:$0xff]  ;;  %v1368_v6 = vld [vmem:[#allocation5 + $0x188] sm:$0xff]  ;;  %v1351_v8 = vld [vmem:[#allocation5 + $0x100] sm:$0xff] }
  0x2b   :  { %687 = vmatpush.bf16.msra.mxu2 %v1337_v22  ;;  %v1376_v7 = vld [vmem:[#allocation5 + $0x1c8] sm:$0xff]  ;;  %v1359_v9 = vld [vmem:[#allocation5 + $0x140] sm:$0xff]  ;;  %v977_v12 = vld [vmem:[#allocation2 + $0x10] sm:$0xf] }
  0x2c   :  { %701 = vmatpush.bf16.msra.mxu3 %v1345_v23  ;;  %v1367_v10 = vld [vmem:[#allocation5 + $0x180] sm:$0xff]  ;;  %v1317_v13 = vld [vmem:[#allocation2 + $0x2c] sm:$0xf0]  ;;  %v1313_v14 = vld [vmem:[#allocation2 + $0x14] sm:$0xf] }
  0x2d   :  { %660 = vmatpush.bf16.msra.mxu0 %v1320_v24  ;;  %v1375_v11 = vld [vmem:[#allocation5 + $0x1c0] sm:$0xff]  ;;  %v979_v15 = vld [vmem:[#allocation2 + $0x30] sm:$0xf0]  ;;  %v985_v16 = vld [vmem:[#allocation2 + $0x18] sm:$0xf]  ;;  %v978_v20 = vor.u32 %v1317_v13, %v977_v12 }
  0x2e   :  { %674 = vmatpush.bf16.msra.mxu1 %v1328_v25  ;;  %v1318_v17 = vld [vmem:[#allocation2 + $0x34] sm:$0xf0]  ;;  %v1314_v18 = vld [vmem:[#allocation2 + $0x1c] sm:$0xf]  ;;  %v982_v21 = vor.u32 %v1313_v14, %v979_v15  ;;  %v1389_v25 = vld [vmem:[#allocation7 + $0x30] sm:$0xff] }
  0x2f   :  { %688 = vmatpush.bf16.msra.mxu2 %v1336_v26  ;;  %v987_v19 = vld [vmem:[#allocation2 + $0x38] sm:$0xf0]  ;;  %v986_v22 = vor.u32 %v1318_v17, %v985_v16  ;;  %v1388_v26 = vld [vmem:[#allocation7 + $0x28] sm:$0xff]  ;;  %v1410_v34 = vld [vmem:[%s1618_s2] ss:$0 sm:$0xff] }
  0x30   :  { %702 = vmatpush.bf16.msra.mxu3 %v1344_v27  ;;  %v990_v23 = vor.u32 %v1314_v18, %v987_v19  ;;  %v1390_v24 = vld [vmem:[#allocation7 + $0x38] sm:$0xff]  ;;  %v1387_v27 = vld [vmem:[#allocation7 + $0x20] sm:$0xff]  ;;  %v1397_v40 = vld [vmem:[#allocation8 + $0x30] sm:$0xff] }
  0x31   :  { %661 = vmatpush.bf16.msra.mxu0 %v1319_v28  ;;  %v1386_v28 = vld [vmem:[#allocation7 + $0x18] sm:$0xff]  ;;  %v1411_v13 = vld [vmem:[%s1620_s4] ss:$0 sm:$0xff]  ;;  %s944_s4 = sshll.u32 %s1623_s7, 4  ;;  %s945_s4 = int_to_ptr.hbm [resolvable:$true] %s944_s4 }
  0x32   :  { %675 = vmatpush.bf16.msra.mxu1 %v1327_v29  ;;  %v1385_v29 = vld [vmem:[#allocation7 + $0x10] sm:$0xff]  ;;  %v1398_v39 = vld [vmem:[#allocation8 + $0x38] sm:$0xff] }
  0x33   :  { %689 = vmatpush.bf16.msra.mxu2 %v1335_v30 }
  0x34   :  { %703 = vmatpush.bf16.msra.mxu3 %v1343_v31  ;;  %662 = vmatmul.bf16.vlgmr.msra.gmra.mxu0 %v962_v45  ;;  %v1384_v31 = vld [vmem:[#allocation7 + $0x8] sm:$0xff] }
  0x35   :  { %710 = vmatpush.bf16.msrb.mxu0 %v1358_v32  ;;  %676 = vmatmul.bf16.vlgmr.msra.gmra.mxu1 %v966_v47 }
  0x36   :  { %724 = vmatpush.bf16.msrb.mxu1 %v1366_v33  ;;  %690 = vmatmul.bf16.vlgmr.msra.gmra.mxu2 %v970_v44  ;;  %v1383_v33 = vld [vmem:[#allocation7] sm:$0xff]  ;;  %v1396_v44 = vld [vmem:[#allocation8 + $0x28] sm:$0xff] }
  0x37   :  { %738 = vmatpush.bf16.msrb.mxu2 %v1374_v42  ;;  %704 = vmatmul.bf16.vlgmr.msra.gmra.mxu3 %v974_v46 }
  0x38   :  { %752 = vmatpush.bf16.msrb.mxu3 %v1382_v43 }
  0x39   :  { %711 = vmatpush.bf16.msrb.mxu0 %v1357_v48 }
  0x3a   :  { %725 = vmatpush.bf16.msrb.mxu1 %v1365_v49 }
  0x3b   :  { %739 = vmatpush.bf16.msrb.mxu2 %v1373_v50  ;;  %v1395_v50 = vld [vmem:[#allocation8 + $0x20] sm:$0xff] }
  0x3c   :  { %753 = vmatpush.bf16.msrb.mxu3 %v1381_v51 }
  0x3d   :  { %712 = vmatpush.bf16.msrb.mxu0 %v1356_v52 }
  0x3e   :  { %726 = vmatpush.bf16.msrb.mxu1 %v1364_v53 }
  0x3f   :  { %740 = vmatpush.bf16.msrb.mxu2 %v1372_v54 }
  0x40   :  { %754 = vmatpush.bf16.msrb.mxu3 %v1380_v55 }
  0x41   :  { %713 = vmatpush.bf16.msrb.mxu0 %v1355_v56 }
  0x42   :  { %727 = vmatpush.bf16.msrb.mxu1 %v1363_v57 }
  0x43   :  { %741 = vmatpush.bf16.msrb.mxu2 %v1371_v58 }
  0x44   :  { %755 = vmatpush.bf16.msrb.mxu3 %v1379_v59 }
  0x45   :  { %714 = vmatpush.bf16.msrb.mxu0 %v1354_v60 }
  0x46   :  { %728 = vmatpush.bf16.msrb.mxu1 %v1362_v61 }
  0x47   :  { %742 = vmatpush.bf16.msrb.mxu2 %v1370_v62 }
  0x48   :  { %756 = vmatpush.bf16.msrb.mxu3 %v1378_v63 }
  0x49   :  { %715 = vmatpush.bf16.msrb.mxu0 %v1353_v0 }
  0x4a   :  { %729 = vmatpush.bf16.msrb.mxu1 %v1361_v1 }
  0x4b   :  { %743 = vmatpush.bf16.msrb.mxu2 %v1369_v2 }
  0x4c   :  { %757 = vmatpush.bf16.msrb.mxu3 %v1377_v3 }
  0x4d   :  { %716 = vmatpush.bf16.msrb.mxu0 %v1352_v4 }
  0x4e   :  { %730 = vmatpush.bf16.msrb.mxu1 %v1360_v5 }
  0x4f   :  { %744 = vmatpush.bf16.msrb.mxu2 %v1368_v6 }
  0x50   :  { %758 = vmatpush.bf16.msrb.mxu3 %v1376_v7 }
  0x51   :  { %717 = vmatpush.bf16.msrb.mxu0 %v1351_v8  ;;  %v1394_v8 = vld [vmem:[#allocation8 + $0x18] sm:$0xff] }
  0x52   :  { %731 = vmatpush.bf16.msrb.mxu1 %v1359_v9  ;;  %v1393_v9 = vld [vmem:[#allocation8 + $0x10] sm:$0xff] }
  0x53   :  { %745 = vmatpush.bf16.msrb.mxu2 %v1367_v10  ;;  %v1392_v10 = vld [vmem:[#allocation8 + $0x8] sm:$0xff] }
  0x54   :  { %759 = vmatpush.bf16.msrb.mxu3 %v1375_v11  ;;  %718 = vmatmul.bf16.vlgmr.msrb.gmra.mxu0 %v978_v20  ;;  %v1391_v11 = vld [vmem:[#allocation8] sm:$0xff] }
  0x55   :  { %732 = vmatmul.bf16.vlgmr.msrb.gmra.mxu1 %v982_v21  ;;  %837 = vmatpush.bf16.msra.mxu0 %v1390_v24  ;;  %v1412_v20 = vld [vmem:[%s1622_s6] ss:$0 sm:$0xff] }
  0x56   :  { %746 = vmatmul.bf16.vlgmr.msrb.gmra.mxu2 %v986_v22  ;;  %922 = vmatpush.bf16.msra.mxu1 %v1398_v39 }
  0x57   :  { %760 = vmatmul.bf16.vlgmr.msrb.gmra.mxu3 %v990_v23 }
  0x59   :  { %838 = vmatpush.bf16.msra.mxu0 %v1389_v25 }
  0x5a   :  { %923 = vmatpush.bf16.msra.mxu1 %v1397_v40 }
  0x5d   :  { %839 = vmatpush.bf16.msra.mxu0 %v1388_v26 }
  0x5e   :  { %924 = vmatpush.bf16.msra.mxu1 %v1396_v44 }
  0x61   :  { %840 = vmatpush.bf16.msra.mxu0 %v1387_v27 }
  0x62   :  { %925 = vmatpush.bf16.msra.mxu1 %v1395_v50 }
  0x65   :  { %841 = vmatpush.bf16.msra.mxu0 %v1386_v28 }
  0x66   :  { %926 = vmatpush.bf16.msra.mxu1 %v1394_v8 }
  0x69   :  { %842 = vmatpush.bf16.msra.mxu0 %v1385_v29 }
  0x6a   :  { %927 = vmatpush.bf16.msra.mxu1 %v1393_v9 }
  0x6d   :  { %843 = vmatpush.bf16.msra.mxu0 %v1384_v31 }
  0x6e   :  { %928 = vmatpush.bf16.msra.mxu1 %v1392_v10 }
  0x71   :  { %844 = vmatpush.bf16.msra.mxu0 %v1383_v33 }
  0x72   :  { %929 = vmatpush.bf16.msra.mxu1 %v1391_v11 }
  0xb1   :  { %v663_v30 = vpop.f32.mrf.mxu0 }
  0xb2   :  { %v677_v32 = vpop.f32.mrf.mxu1  ;;  %v664_v37 = vadd.f32 %v1410_v34, %v663_v30 }
  0xb4   :  { %v678_v42 = vadd.f32 %v677_v32, %v664_v37 }
  0xb9   :  { %v691_v35 = vpop.f32.mrf.mxu2  ;;  %v665_v38 = vpop.f32.mrf.mxu0 }
  0xba   :  { %v705_v36 = vpop.f32.mrf.mxu3  ;;  %v679_v41 = vpop.f32.mrf.mxu1  ;;  %v666_v43 = vadd.f32 %v1410_v34, %v665_v38  ;;  %v692_v47 = vadd.f32 %v691_v35, %v678_v42 }
  0xbc   :  { %v680_v48 = vadd.f32 %v679_v41, %v666_v43  ;;  %v706_v52 = vadd.f32 %v705_v36, %v692_v47 }
  0xc1   :  { %v693_v45 = vpop.f32.mrf.mxu2 }
  0xc2   :  { %v707_v46 = vpop.f32.mrf.mxu3  ;;  %v694_v53 = vadd.f32 %v693_v45, %v680_v48 }
  0xc4   :  { %v708_v57 = vadd.f32 %v707_v46, %v694_v53 }
  0xd1   :  { %v719_v49 = vpop.f32.mrf.mxu0 }
  0xd2   :  { %v733_v51 = vpop.f32.mrf.mxu1  ;;  %v720_v54 = vadd.f32 %v719_v49, %v706_v52 }
  0xd4   :  { %v734_v59 = vadd.f32 %v733_v51, %v720_v54 }
  0xd9   :  { %v747_v55 = vpop.f32.mrf.mxu2  ;;  %v721_v58 = vpop.f32.mrf.mxu0 }
  0xda   :  { %v761_v56 = vpop.f32.mrf.mxu3  ;;  %v722_v60 = vadd.f32 %v721_v58, %v708_v57  ;;  %v748_v61 = vadd.f32 %v747_v55, %v734_v59  ;;  %v735_v62 = vpop.f32.mrf.mxu1 }
  0xdc   :  { %v736_v63 = vadd.f32 %v735_v62, %v722_v60  ;;  %v762_v1 = vadd.f32 %v761_v56, %v748_v61 }
  0xde   :  { %v766_v5 = vmax.f32 %v762_v1, 0.0 }
  0xe1   :  { %v749_v0 = vpop.f32.mrf.mxu2 }
  0xe2   :  { %v750_v2 = vadd.f32 %v749_v0, %v736_v63  ;;  %v763_v3 = vpop.f32.mrf.mxu3 }
  0xe4   :  { %v764_v4 = vadd.f32 %v763_v3, %v750_v2 }
  0xe6   :  { %v767_v6 = vmax.f32 %v764_v4, 0.0 }
  0xe8   :  { %v768_v7 = vpack.c.bf16 %v767_v6, %v766_v5 }
  0xea   :  { %845 = vmatmul.bf16.vlgmr.msra.gmra.mxu0 %v768_v7 }
 0x167   :  { %v846_v12 = vpop.f32.mrf.mxu0 }
 0x168   :  { %v847_v14 = vadd.f32 %v1411_v13, %v846_v12 }
 0x16a   :  { %v851_v17 = vmax.f32 %v847_v14, 0.0 }
 0x16f   :  { %v848_v15 = vpop.f32.mrf.mxu0 }
 0x170   :  { %v849_v16 = vadd.f32 %v1411_v13, %v848_v15 }
 0x172   :  { %v852_v18 = vmax.f32 %v849_v16, 0.0 }
 0x174   :  { %v853_v19 = vpack.c.bf16 %v852_v18, %v851_v17 }
 0x176   :  { %930 = vmatmul.bf16.vlgmr.msra.gmra.mxu1 %v853_v19 }
 0x1f3   :  { %v931_v21 = vpop.f32.mrf.mxu1 }
 0x1f4   :  { %v932_v22 = vadd.f32 %v1412_v20, %v931_v21 }
 0x1f6   :  { %936 = vst [vmem:[#allocation10] sm:$0xff] %v932_v22 }
 0x1fb   :  { %v933_v23 = vpop.f32.mrf.mxu1 }
 0x1fc   :  { %v934_v24 = vadd.f32 %v1412_v20, %v933_v23 }
 0x1fe   :  { %937 = vst [vmem:[#allocation10 + $0x8] sm:$0xff] %v934_v24 }
 0x1ff   :  { %950 = dma.vmem_to_hbm [thread:$0]  %s943_s27, 256, %s945_s4, [#allocation4], %s1550_s30, %s1550_s30, %s1551_s8  }
 0x200   :  { %1539 = dma.done.wait [#allocation4], 256  }
 0x201   :  { %1540 = vsyncadd [#allocation4], 4294967040 }
 0x202   :  { %955 = vsyncpa [#allocation3], 1 }
 0x203   :  { %956 = vsyncpa [#allocation6], 1 }
 0x204   :  { %957 = vsyncpa [#allocation9], 1 }
 0x205   :  { %958 = vsyncpa [#allocation4], 1 }

</bundles_post_ra>
